<compile_context>
chip_gen: v6e
topology: v6e:2x2x1
jax: 0.10.0
libtpu: 0.0.40
codegen_flags: <defaults>
</compile_context>

<pallas_src>
import jax
import jax.numpy as jnp
from jax import lax
from jax.experimental import pallas as pl
from jax.experimental.pallas import tpu as pltpu

_LANES = 128
_MAX_CHUNK_ROWS = 4096  # 4096*128*4B = 2 MiB per input per pipeline buffer


def _round_up(x, m):
    return ((x + m - 1) // m) * m


def _make_kernel(chunk_rows, cps, num_chunks, rows_kernel, needs_mask, hard_targets):
    groups = chunk_rows // 8

    def fold8(x):  # (chunk_rows, 128) -> (8, 128) via vreg-to-vreg VPU adds only
        return jnp.sum(x.reshape(groups, 8, _LANES), axis=0)

    def accum(out_ref, p, t, mask):
        if hard_targets:
            # valid only for hard {0,1} targets; exactly equal to the two-log form there
            bce = -jnp.maximum(jnp.log(jnp.where(t > 0.5, p, 1.0 - p)), -100.0)
        else:
            # PyTorch nn.BCELoss clamps the log terms at -100; clamp BEFORE the multiply.
            log_p = jnp.maximum(jnp.log(p), -100.0)
            log_1mp = jnp.maximum(jnp.log(1.0 - p), -100.0)
            bce = -(t * log_p + (1.0 - t) * log_1mp)
        ps = jax.nn.sigmoid(p)          # sigmoid applied again, matching temp_DiceLoss
        inter = ps * t
        tq = t
        if mask is not None:
            # element-select (not multiply) so NaN/Inf garbage in OOB rows cannot leak
            bce = jnp.where(mask, bce, 0.0)
            inter = jnp.where(mask, inter, 0.0)
            ps = jnp.where(mask, ps, 0.0)
            tq = jnp.where(mask, tq, 0.0)
        out_ref[0, 0, 0:8, :] += fold8(bce)
        out_ref[0, 0, 8:16, :] += fold8(inter)
        out_ref[0, 0, 16:24, :] += fold8(ps)
        out_ref[0, 0, 24:32, :] += fold8(tq)

    def kernel(pred_ref, target_ref, out_ref):
        s = pl.program_id(1)
        c = pl.program_id(2)

        @pl.when(c == 0)
        def _():
            out_ref[...] = jnp.zeros_like(out_ref)

        p = pred_ref[0].astype(jnp.float32)     # (chunk_rows, 128)
        t = target_ref[0].astype(jnp.float32)   # (chunk_rows, 128)

        if not needs_mask:
            accum(out_ref, p, t, None)
        else:
            g = s * cps + c                     # global chunk index (unclamped)
            last = num_chunks - 1

            @pl.when(g < last)
            def _():
                accum(out_ref, p, t, None)      # full chunks: no mask cost

            @pl.when(g >= last)
            def _():
                valid = rows_kernel - g * chunk_rows   # <=0 for overflow chunks -> all masked
                row_idx = lax.broadcasted_iota(jnp.int32, (chunk_rows, _LANES), 0)
                accum(out_ref, p, t, row_idx < valid)

    return kernel


def _run_kernel(pred3, target3, hard_targets):
    B, rows_kernel, _ = pred3.shape

    if rows_kernel <= _MAX_CHUNK_ROWS:
        chunk_rows = rows_kernel                 # rows_kernel is a multiple of 8
    else:
        n_target = pl.cdiv(rows_kernel, _MAX_CHUNK_ROWS)
        chunk_rows = _round_up(pl.cdiv(rows_kernel, n_target), 8)
    num_chunks = pl.cdiv(rows_kernel, chunk_rows)
    num_splits = 2 if num_chunks >= 2 else 1     # feeds both v7x TCs even when B==1
    cps = pl.cdiv(num_chunks, num_splits)
    needs_mask = (chunk_rows * cps * num_splits) != rows_kernel

    kernel = _make_kernel(chunk_rows, cps, num_chunks, rows_kernel, needs_mask, hard_targets)

    n_elem = B * rows_kernel * _LANES
    in_bytes = n_elem * (pred3.dtype.itemsize + target3.dtype.itemsize)
    out_bytes = B * num_splits * 32 * _LANES * 4
    cost = pl.CostEstimate(
        flops=int(16 * n_elem),
        transcendentals=int((2 if hard_targets else 3) * n_elem),
        bytes_accessed=int(in_bytes + out_bytes),
    )

    def in_map(b, s, c):
        # clamp overflow chunks onto the last real chunk (same block as previous step ->
        # no extra DMA); their contribution is masked to zero in-kernel.
        return (b, jnp.minimum(s * cps + c, num_chunks - 1), 0)

    return pl.pallas_call(
        kernel,
        out_shape=jax.ShapeDtypeStruct((B, num_splits, 32, _LANES), jnp.float32),
        grid_spec=pltpu.PrefetchScalarGridSpec(
            num_scalar_prefetch=0,
            grid=(B, num_splits, cps),
            in_specs=[
                pl.BlockSpec((1, chunk_rows, _LANES), in_map),
                pl.BlockSpec((1, chunk_rows, _LANES), in_map),
            ],
            out_specs=pl.BlockSpec((1, 1, 32, _LANES), lambda b, s, c: (b, s, 0, 0)),
        ),
        compiler_params=pltpu.CompilerParams(
            dimension_semantics=("parallel", "parallel", "arbitrary")),
        cost_estimate=cost,
    )(pred3, target3)


def _jax_partial_sums(p, t):
    """Per-batch (bce_sum, inter, psum, tsum) for a (B, M) slab — used for tiny tails."""
    p = p.astype(jnp.float32)
    t = t.astype(jnp.float32)
    log_p = jnp.maximum(jnp.log(p), -100.0)
    log_1mp = jnp.maximum(jnp.log(1.0 - p), -100.0)
    bce = -(t * log_p + (1.0 - t) * log_1mp)
    ps = jax.nn.sigmoid(p)
    return (jnp.sum(bce, axis=1), jnp.sum(ps * t, axis=1),
            jnp.sum(ps, axis=1), jnp.sum(t, axis=1))


def bce_dice_loss(pred, target, wb=1.0, wd=1.0, hard_targets=False):
    assert pred.shape == target.shape and pred.ndim == 4
    B, C, H, W = pred.shape
    N = C * H * W

    rows128 = N // _LANES
    rows_kernel = (rows128 // 8) * 8            # 8x128-aligned prefix handled by the kernel
    kelems = rows_kernel * _LANES

    bce_s = jnp.zeros((B,), jnp.float32)
    inter_s = jnp.zeros((B,), jnp.float32)
    psum_s = jnp.zeros((B,), jnp.float32)
    tsum_s = jnp.zeros((B,), jnp.float32)

    if rows_kernel > 0:
        if kelems == N:
            pred3 = pred.reshape(B, rows_kernel, _LANES)      # free reshape, no copy
            target3 = target.reshape(B, rows_kernel, _LANES)
        else:
            pred3 = pred.reshape(B, N)[:, :kelems].reshape(B, rows_kernel, _LANES)
            target3 = target.reshape(B, N)[:, :kelems].reshape(B, rows_kernel, _LANES)
        partials = _run_kernel(pred3, target3, hard_targets)   # (B, S, 32, 128)
        sums = jnp.sum(partials.reshape(B, -1, 4, 8, _LANES), axis=(1, 3, 4))  # (B, 4)
        bce_s, inter_s, psum_s, tsum_s = sums[:, 0], sums[:, 1], sums[:, 2], sums[:, 3]

    if kelems < N:
        # tail is < 8*128 + 128 = 1152 elements per batch (or the whole thing if N < 1024)
        p_tail = pred.reshape(B, N)[:, kelems:]
        t_tail = target.reshape(B, N)[:, kelems:]
        tb, ti, tp, tt = _jax_partial_sums(p_tail, t_tail)
        bce_s = bce_s + tb
        inter_s = inter_s + ti
        psum_s = psum_s + tp
        tsum_s = tsum_s + tt

    bceloss = jnp.sum(bce_s) / float(B * N)
    diceloss = 1.0 - jnp.mean((2.0 * inter_s + 1.0) / (psum_s + tsum_s + inter_s + 1.0))
    return wd * diceloss + wb * bceloss


def _reference(pred, target, wb=1.0, wd=1.0):
    # pure-JAX reference mirroring the PyTorch module
    B = pred.shape[0]
    p = pred.reshape(B, -1).astype(jnp.float32)
    t = target.reshape(B, -1).astype(jnp.float32)
    bce = jnp.mean(-(t * jnp.maximum(jnp.log(p), -100.0)
                     + (1.0 - t) * jnp.maximum(jnp.log(1.0 - p), -100.0)))
    ps = jax.nn.sigmoid(pred.astype(jnp.float32))
    tf = target.astype(jnp.float32)
    inter = jnp.sum(ps * tf, axis=(1, 2, 3))
    psum = jnp.sum(ps, axis=(1, 2, 3))
    tsum = jnp.sum(tf, axis=(1, 2, 3))
    dice = 1.0 - jnp.mean((2.0 * inter + 1.0) / (psum + tsum + inter + 1.0))
    return wd * dice + wb * bce


if __name__ == "__main__":
    key = jax.random.PRNGKey(0)
    k1, k2, k3, k4, k5, k6, k7, k8 = jax.random.split(key, 8)

    def make(shape, ka, kb):
        # pred must be in (0,1) for BCELoss -> feed sigmoid-squashed logits
        pred = jax.nn.sigmoid(jax.random.normal(ka, shape, jnp.float32))
        target = (jax.random.uniform(kb, shape) > 0.5).astype(jnp.float32)
        return pred, target

    # 1) Primary small test: lane/sublane aligned (C*H*W = 1024) -> zero-copy path.
    p1, t1 = make((2, 4, 16, 16), k1, k2)
    l1 = jax.block_until_ready(bce_dice_loss(p1, t1, wb=1.0, wd=1.0))
    r1 = jax.block_until_ready(_reference(p1, t1))
    assert jnp.allclose(l1, r1, atol=1e-4, rtol=1e-4), (l1, r1)

    # 1b) Hard-target single-log fast path (targets here are {0,1}).
    l1h = jax.block_until_ready(bce_dice_loss(p1, t1, hard_targets=True))
    assert jnp.allclose(l1h, r1, atol=1e-4, rtol=1e-4), (l1h, r1)

    # 2) Non-aligned shape: kernel on the aligned prefix + tiny JAX tail.
    p2, t2 = make((2, 3, 33, 19), k3, k4)
    l2 = jax.block_until_ready(bce_dice_loss(p2, t2))
    r2 = jax.block_until_ready(_reference(p2, t2))
    assert jnp.allclose(l2, r2, atol=1e-4, rtol=1e-4), (l2, r2)

    # 3) Tiny shape (N < 1024): all-JAX fallback path.
    p3, t3 = make((2, 3, 17, 19), k5, k6)
    l3 = jax.block_until_ready(bce_dice_loss(p3, t3))
    r3 = jax.block_until_ready(_reference(p3, t3))
    assert jnp.allclose(l3, r3, atol=1e-4, rtol=1e-4), (l3, r3)

    # 4) Multi-chunk + 2-way split + in-kernel last-chunk row mask.
    p4, t4 = make((1, 4, 400, 400), k7, k8)
    l4 = jax.block_until_ready(bce_dice_loss(p4, t4))
    r4 = jax.block_until_ready(_reference(p4, t4))
    assert jnp.allclose(l4, r4, atol=1e-3, rtol=1e-3), (l4, r4)

    print("KERNEL_OK")
</pallas_src>

<mosaic_0001>
module attributes {stable_mosaic.version = 11 : i64} {
  func.func @kernel(%arg0: i32, %arg1: i32, %arg2: i32, %arg3: memref<1x8x128xf32, #tpu.memory_space<vmem>>, %arg4: memref<1x8x128xf32, #tpu.memory_space<vmem>>, %arg5: memref<1x1x32x128xf32, #tpu.memory_space<vmem>>) attributes {dimension_semantics = [#tpu.dimension_semantics<parallel>, #tpu.dimension_semantics<parallel>, #tpu.dimension_semantics<arbitrary>], iteration_bounds = array<i64: 2, 1, 1>, scalar_prefetch = 0 : i64, scratch_operands = 0 : i64, tpu.core_type = #tpu.core_type<tc>, window_params = [{transform_indices = @transform_0, window_bounds = array<i64: 1, 8, 128>}, {transform_indices = @transform_1, window_bounds = array<i64: 1, 8, 128>}, {transform_indices = @transform_2, window_bounds = array<i64: 1, 1, 32, 128>}]} {
    %c0_i32 = arith.constant 0 : i32
    %0 = arith.cmpi eq, %arg2, %c0_i32 : i32
    %1 = arith.extui %0 : i1 to i32
    %c0_i32_0 = arith.constant 0 : i32
    %2 = arith.cmpi ne, %1, %c0_i32_0 : i32
    scf.if %2 {
      %cst_44 = arith.constant 0.000000e+00 : f32
      %60 = vector.broadcast %cst_44 : f32 to vector<1x1x32x128xf32>
      %c0_45 = arith.constant 0 : index
      %c0_46 = arith.constant 0 : index
      %c0_47 = arith.constant 0 : index
      %c0_48 = arith.constant 0 : index
      %61 = vector.load %arg5[%c0_45, %c0_46, %c0_47, %c0_48] : memref<1x1x32x128xf32, #tpu.memory_space<vmem>>, vector<1x1x32x128xf32>
      tpu.vector_store %arg5[%c0_45, %c0_46, %c0_47, %c0_48], %60 {strides = array<i32>} : memref<1x1x32x128xf32, #tpu.memory_space<vmem>>, vector<1x1x32x128xf32>,
    } else {
    }
    %c0 = arith.constant 0 : index
    %c0_1 = arith.constant 0 : index
    %c0_2 = arith.constant 0 : index
    %3 = vector.load %arg3[%c0, %c0_1, %c0_2] : memref<1x8x128xf32, #tpu.memory_space<vmem>>, vector<1x8x128xf32>
    %4 = vector.shape_cast %3 : vector<1x8x128xf32> to vector<8x128xf32>
    %c0_3 = arith.constant 0 : index
    %c0_4 = arith.constant 0 : index
    %c0_5 = arith.constant 0 : index
    %5 = vector.load %arg4[%c0_3, %c0_4, %c0_5] : memref<1x8x128xf32, #tpu.memory_space<vmem>>, vector<1x8x128xf32>
    %6 = vector.shape_cast %5 : vector<1x8x128xf32> to vector<8x128xf32>
    %7 = math.log %4 : vector<8x128xf32>
    %cst = arith.constant -1.000000e+02 : f32
    %8 = vector.broadcast %cst : f32 to vector<8x128xf32>
    %9 = arith.maximumf %7, %8 : vector<8x128xf32>
    %cst_6 = arith.constant 1.000000e+00 : f32
    %10 = vector.broadcast %cst_6 : f32 to vector<8x128xf32>
    %11 = arith.subf %10, %4 : vector<8x128xf32>
    %12 = math.log %11 : vector<8x128xf32>
    %cst_7 = arith.constant -1.000000e+02 : f32
    %13 = vector.broadcast %cst_7 : f32 to vector<8x128xf32>
    %14 = arith.maximumf %12, %13 : vector<8x128xf32>
    %15 = arith.mulf %6, %9 : vector<8x128xf32>
    %cst_8 = arith.constant 1.000000e+00 : f32
    %16 = vector.broadcast %cst_8 : f32 to vector<8x128xf32>
    %17 = arith.subf %16, %6 : vector<8x128xf32>
    %18 = arith.mulf %17, %14 : vector<8x128xf32>
    %19 = arith.addf %15, %18 : vector<8x128xf32>
    %cst_9 = arith.constant 0.000000e+00 : f32
    %20 = vector.broadcast %cst_9 : f32 to vector<8x128xf32>
    %21 = arith.subf %20, %19 : vector<8x128xf32>
    %22 = arith.negf %4 : vector<8x128xf32>
    %23 = math.exp %22 : vector<8x128xf32>
    %cst_10 = arith.constant 1.000000e+00 : f32
    %24 = vector.broadcast %cst_10 : f32 to vector<8x128xf32>
    %25 = arith.addf %24, %23 : vector<8x128xf32>
    %26 = arith.divf %24, %25 : vector<8x128xf32>
    %27 = arith.mulf %26, %6 : vector<8x128xf32>
    %c0_11 = arith.constant 0 : index
    %c0_12 = arith.constant 0 : index
    %c0_13 = arith.constant 0 : index
    %c0_14 = arith.constant 0 : index
    %28 = vector.load %arg5[%c0_11, %c0_12, %c0_13, %c0_14] : memref<1x1x32x128xf32, #tpu.memory_space<vmem>>, vector<1x1x8x128xf32>
    %29 = vector.shape_cast %28 : vector<1x1x8x128xf32> to vector<8x128xf32>
    %30 = vector.shape_cast %21 : vector<8x128xf32> to vector<1x8x128xf32>
    %cst_15 = arith.constant dense<0.000000e+00> : vector<8x128xf32>
    %31 = vector.multi_reduction <add>, %30, %cst_15 [0] : vector<1x8x128xf32> to vector<8x128xf32>
    %32 = arith.addf %29, %31 : vector<8x128xf32>
    %c0_16 = arith.constant 0 : index
    %c0_17 = arith.constant 0 : index
    %c0_18 = arith.constant 0 : index
    %c0_19 = arith.constant 0 : index
    %33 = vector.load %arg5[%c0_16, %c0_17, %c0_18, %c0_19] : memref<1x1x32x128xf32, #tpu.memory_space<vmem>>, vector<1x1x8x128xf32>
    %34 = vector.shape_cast %33 : vector<1x1x8x128xf32> to vector<8x128xf32>
    %35 = vector.shape_cast %32 : vector<8x128xf32> to vector<1x1x8x128xf32>
    tpu.vector_store %arg5[%c0_16, %c0_17, %c0_18, %c0_19], %35 {strides = array<i32>} : memref<1x1x32x128xf32, #tpu.memory_space<vmem>>, vector<1x1x8x128xf32>,
    %c0_20 = arith.constant 0 : index
    %c0_21 = arith.constant 0 : index
    %c8 = arith.constant 8 : index
    %c0_22 = arith.constant 0 : index
    %36 = vector.load %arg5[%c0_20, %c0_21, %c8, %c0_22] : memref<1x1x32x128xf32, #tpu.memory_space<vmem>>, vector<1x1x8x128xf32>
    %37 = vector.shape_cast %36 : vector<1x1x8x128xf32> to vector<8x128xf32>
    %38 = vector.shape_cast %27 : vector<8x128xf32> to vector<1x8x128xf32>
    %cst_23 = arith.constant dense<0.000000e+00> : vector<8x128xf32>
    %39 = vector.multi_reduction <add>, %38, %cst_23 [0] : vector<1x8x128xf32> to vector<8x128xf32>
    %40 = arith.addf %37, %39 : vector<8x128xf32>
    %c0_24 = arith.constant 0 : index
    %c0_25 = arith.constant 0 : index
    %c8_26 = arith.constant 8 : index
    %c0_27 = arith.constant 0 : index
    %41 = vector.load %arg5[%c0_24, %c0_25, %c8_26, %c0_27] : memref<1x1x32x128xf32, #tpu.memory_space<vmem>>, vector<1x1x8x128xf32>
    %42 = vector.shape_cast %41 : vector<1x1x8x128xf32> to vector<8x128xf32>
    %43 = vector.shape_cast %40 : vector<8x128xf32> to vector<1x1x8x128xf32>
    tpu.vector_store %arg5[%c0_24, %c0_25, %c8_26, %c0_27], %43 {strides = array<i32>} : memref<1x1x32x128xf32, #tpu.memory_space<vmem>>, vector<1x1x8x128xf32>,
    %c0_28 = arith.constant 0 : index
    %c0_29 = arith.constant 0 : index
    %c16 = arith.constant 16 : index
    %c0_30 = arith.constant 0 : index
    %44 = vector.load %arg5[%c0_28, %c0_29, %c16, %c0_30] : memref<1x1x32x128xf32, #tpu.memory_space<vmem>>, vector<1x1x8x128xf32>
    %45 = vector.shape_cast %44 : vector<1x1x8x128xf32> to vector<8x128xf32>
    %46 = vector.shape_cast %26 : vector<8x128xf32> to vector<1x8x128xf32>
    %cst_31 = arith.constant dense<0.000000e+00> : vector<8x128xf32>
    %47 = vector.multi_reduction <add>, %46, %cst_31 [0] : vector<1x8x128xf32> to vector<8x128xf32>
    %48 = arith.addf %45, %47 : vector<8x128xf32>
    %c0_32 = arith.constant 0 : index
    %c0_33 = arith.constant 0 : index
    %c16_34 = arith.constant 16 : index
    %c0_35 = arith.constant 0 : index
    %49 = vector.load %arg5[%c0_32, %c0_33, %c16_34, %c0_35] : memref<1x1x32x128xf32, #tpu.memory_space<vmem>>, vector<1x1x8x128xf32>
    %50 = vector.shape_cast %49 : vector<1x1x8x128xf32> to vector<8x128xf32>
    %51 = vector.shape_cast %48 : vector<8x128xf32> to vector<1x1x8x128xf32>
    tpu.vector_store %arg5[%c0_32, %c0_33, %c16_34, %c0_35], %51 {strides = array<i32>} : memref<1x1x32x128xf32, #tpu.memory_space<vmem>>, vector<1x1x8x128xf32>,
    %c0_36 = arith.constant 0 : index
    %c0_37 = arith.constant 0 : index
    %c24 = arith.constant 24 : index
    %c0_38 = arith.constant 0 : index
    %52 = vector.load %arg5[%c0_36, %c0_37, %c24, %c0_38] : memref<1x1x32x128xf32, #tpu.memory_space<vmem>>, vector<1x1x8x128xf32>
    %53 = vector.shape_cast %52 : vector<1x1x8x128xf32> to vector<8x128xf32>
    %54 = vector.shape_cast %6 : vector<8x128xf32> to vector<1x8x128xf32>
    %cst_39 = arith.constant dense<0.000000e+00> : vector<8x128xf32>
    %55 = vector.multi_reduction <add>, %54, %cst_39 [0] : vector<1x8x128xf32> to vector<8x128xf32>
    %56 = arith.addf %53, %55 : vector<8x128xf32>
    %c0_40 = arith.constant 0 : index
    %c0_41 = arith.constant 0 : index
    %c24_42 = arith.constant 24 : index
    %c0_43 = arith.constant 0 : index
    %57 = vector.load %arg5[%c0_40, %c0_41, %c24_42, %c0_43] : memref<1x1x32x128xf32, #tpu.memory_space<vmem>>, vector<1x1x8x128xf32>
    %58 = vector.shape_cast %57 : vector<1x1x8x128xf32> to vector<8x128xf32>
    %59 = vector.shape_cast %56 : vector<8x128xf32> to vector<1x1x8x128xf32>
    tpu.vector_store %arg5[%c0_40, %c0_41, %c24_42, %c0_43], %59 {strides = array<i32>} : memref<1x1x32x128xf32, #tpu.memory_space<vmem>>, vector<1x1x8x128xf32>,
    return
  }
  func.func @transform_0(%arg0: i32, %arg1: i32, %arg2: i32) -> (i32, i32, i32) {
    %c1_i32 = arith.constant 1 : i32
    %0 = arith.muli %arg1, %c1_i32 : i32
    %1 = arith.addi %0, %arg2 : i32
    %c0_i32 = arith.constant 0 : i32
    %2 = arith.minsi %1, %c0_i32 : i32
    %c0_i32_0 = arith.constant 0 : i32
    %c0_i32_1 = arith.constant 0 : i32
    return %arg0, %2, %c0_i32_0 : i32, i32, i32
  }
  func.func @transform_1(%arg0: i32, %arg1: i32, %arg2: i32) -> (i32, i32, i32) {
    %c1_i32 = arith.constant 1 : i32
    %0 = arith.muli %arg1, %c1_i32 : i32
    %1 = arith.addi %0, %arg2 : i32
    %c0_i32 = arith.constant 0 : i32
    %2 = arith.minsi %1, %c0_i32 : i32
    %c0_i32_0 = arith.constant 0 : i32
    %c0_i32_1 = arith.constant 0 : i32
    return %arg0, %2, %c0_i32_0 : i32, i32, i32
  }
  func.func @transform_2(%arg0: i32, %arg1: i32, %arg2: i32) -> (i32, i32, i32, i32) {
    %c0_i32 = arith.constant 0 : i32
    %c0_i32_0 = arith.constant 0 : i32
    %c0_i32_1 = arith.constant 0 : i32
    return %arg0, %arg1, %c0_i32, %c0_i32_0 : i32, i32, i32, i32
  }
}

</mosaic_0001>

<bundles_post_ra>
// kernel: tpu_custom_call.1
= control target key start
LH: loop header
LB: loop body
LE: loop exit
PB: predicated region body
PF: predicated region fallthrough
CT: control target
= control target key end

     0   :  { %7 = vsyncpa [#allocation3], 0  ;;  %s855_s0 = inlined_call_operand.hbm [shape: f32[2,8,128], index: 0, kind: input, shape index: {}]   ;;  %s856_s1 = inlined_call_operand.hbm [shape: f32[2,8,128], index: 1, kind: input, shape index: {}]   ;;  %s857_s2 = inlined_call_operand.hbm [shape: f32[2,1,32,128], index: 2, kind: output, shape index: {}]  }
   0x1   :  { %9 = vsyncpa [#allocation3 + $0x1], 0 }
   0x2   :  { %10 = vsyncpa [#allocation6], 0 }
   0x3   :  { %12 = vsyncpa [#allocation6 + $0x1], 0 }
   0x4   :  { %13 = vsyncpa [#allocation4], 0 }
   0x5   :  { %15 = vsyncpa [#allocation4 + $0x1], 0  ;;  %s679_s9 = smov 0   ;;  %s681_s10 = smov 0  }
   0x6   :  { %s683_s11 = smov 0   ;;  %s685_s12 = smov 0  }
   0x7   :  { %s687_s13 = smov 0   ;;  %s689_s14 = smov 0  }
   0x8 LB: > { %s420_s15 = sadd.s32 4294967295, %s657_s14   ;;  %s421_s16 = sadd.s32 4294967294, %s657_s14   ;;  %s657_s14 = sphi %s689_s14, %s21_s14   ;;  %s653_s13 = sphi %s687_s13, %s869_s13   ;;  %s649_s12 = sphi %s685_s12, %s868_s12   ;;  %s645_s11 = sphi %s683_s11, %s867_s11   ;;  %s641_s10 = sphi %s681_s10, %s866_s10   ;;  %s637_s9 = sphi %s679_s9, %s865_s9  }
   0x9   : > { %s40_s17 = sadd.s32 1, %s653_s13  ;;  %s55_s18 = sadd.s32 1, %s645_s11 }
   0xa   : > { %p42_p0 = scmp.ge.s32.totalorder %s40_s17, 2  ;;  %p62_p1 = scmp.ne.s32.totalorder %s645_s11, %s641_s10 }
   0xb   : > { %p63_p2 = scmp.eq.s32.totalorder %s657_s14, 0  ;;  %p68_p3 = scmp.ne.s32.totalorder %s641_s10, %s637_s9 }
   0xc   : > { %s871_s17 = smov (%p42_p0, %s40_s17), 0  ;;  %p69_p5 = scmp.eq.s32.totalorder %s420_s15, 0 }
   0xd   : > { %p720_p4 = por %p63_p2, %p62_p1  ;;  %s50_s20 = ssub.s32 %s653_s13, %s871_s17 }
   0xe   : > { %p128_p6 = scmp.eq.s32.totalorder %s420_s15, 1  ;;  %p53_p7 = scmp.eq.s32.totalorder %s50_s20, 0 }
   0xf   : > { %p726_p8 = por %p69_p5, %p68_p3  ;;  %p134_p10 = scmp.eq.s32.totalorder %s421_s16, 1 }
  0x10   : > { %p730_p9 = por %p128_p6, %p62_p1  ;;  %p456_p13 = scmp.lt.s32.totalorder %s657_s14, 2 }
  0x11   : > { %s735_s23 = scalar_select %p53_p7, %s645_s11, %s55_s18  }
  0x12   : > { %p737_p11 = por %p134_p10, %p68_p3  ;;  %s744_s25 = sand.u32 1, %s645_s11  }
  0x13   : > { %s424_s26 = sshll.u32 %s744_s25, 3  ;;  %s425_s27 = sshll.u32 %s653_s13, 7 }
  0x14   : > { %s167_s30 = scalar_lea.hbm %s855_s0, %s425_s27  ;;  %s158_s3 = scalar_lea.vmem [#allocation2], %s424_s26 }
  0x15   : > { %s169_s4 = sshll.u32 %s158_s3, 4  ;;  %p753_p0 = pnand %p456_p13, %p720_p4  ;;  %s170_s4 = int_to_ptr.vmem [resolvable:$true] %s169_s4 }
  0x16   : > { %p428_p1 = scmp.ge.s32.totalorder %s657_s14, 1  ;;  %p196_p2 = scmp.lt.s32.totalorder %s657_s14, 3 }
  0x17   : > { %s155_s6 = scalar_lea.sflag [#allocation3], %s744_s25  ;;  %p519_p3 = pneg %p753_p0 }
  0x18   : > { %s530_s7 = scalar_lea.vmem %s170_s4, 128  ;;  %s659_s8 = smov [#allocation2]  }
  0x19   : > { %p531_p5 = scmp.ne.s32.totalorder %s170_s4, %s530_s7  ;;  %s535_s15 = sshll.u32 %s659_s8, 4  ;;  %s536_s15 = int_to_ptr.vmem [resolvable:$false] %s535_s15 }
  0x1a   : > { %s537_s16 = scalar_lea.vmem %s536_s15, 256  ;;  %p538_p4 = scmp.lt.s32.totalorder %s170_s4, %s536_s15 }
  0x1b   : > { %p533_p6 = pnand %p531_p5, %p519_p3  ;;  %p539_p10 = scmp.lt.s32.totalorder %s537_s16, %s530_s7 }
  0x1d   : > { %p534_p7 = pneg %p533_p6  ;;  %p540_p13 = por %p539_p10, %p538_p4 }
  0x1f   : > { %p541_p12 = pnand %p540_p13, %p534_p7 }
  0x21   : > { %544 = shalt.err (!%p541_p12)
}
  0x22   : > { %448 = dma.hbm_to_vmem [thread:$0]  (!%p753_p0), %s167_s30, 128, %s170_s4, %s155_s6  }
  0x23   : > { %p771_p5 = pnand %p428_p1, %p196_p2  ;;  %s189_s28 = scalar_lea.hbm %s856_s1, %s425_s27 }
  0x24   : > { %s180_s29 = scalar_lea.vmem [#allocation5], %s424_s26  ;;  %s177_s7 = scalar_lea.sflag [#allocation6], %s744_s25 }
  0x25   : > { %s191_s3 = sshll.u32 %s180_s29, 4  ;;  %s660_s30 = smov [#allocation5]   ;;  %s192_s3 = int_to_ptr.vmem [resolvable:$true] %s191_s3 }
  0x26   : > { %s558_s8 = scalar_lea.vmem %s192_s3, 128  ;;  %s563_s4 = sshll.u32 %s660_s30, 4  ;;  %s564_s4 = int_to_ptr.vmem [resolvable:$false] %s563_s4 }
  0x27   : > { %p559_p12 = scmp.ne.s32.totalorder %s192_s3, %s558_s8  ;;  %s565_s6 = scalar_lea.vmem %s564_s4, 256 }
  0x28   : > { %p566_p1 = scmp.lt.s32.totalorder %s192_s3, %s564_s4  ;;  %p567_p2 = scmp.lt.s32.totalorder %s565_s6, %s558_s8 }
  0x29   : > { %p561_p6 = pnand %p559_p12, %p519_p3 }
  0x2a   : > { %p568_p4 = por %p567_p2, %p566_p1 }
  0x2b   : > { %p562_p7 = pneg %p561_p6 }
  0x2d   : > { %p569_p10 = pnand %p568_p4, %p562_p7 }
  0x2f   : > { %572 = shalt.err (!%p569_p10)
}
  0x30   : > { %451 = dma.hbm_to_vmem [thread:$0]  (!%p753_p0), %s189_s28, 128, %s192_s3, %s177_s7  }
  0x31   : > { %200 = sbr.rel (%p771_p5) target bundleno = 107 (0x6b), region = 28  ;;  %s787_s25 = sand.u32 (!%p771_p5), 1, %s641_s10  }
  0x32   : > { %s429_s26 = sshll.u32 (!%p771_p5), %s787_s25, 3  ;;  %s203_s27 = scalar_lea.sflag (!%p771_p5), [#allocation3], %s787_s25 }
  0x33   : > { %s206_s15 = scalar_lea.vmem (!%p771_p5), [#allocation2], %s429_s26 }
  0x36   : > { %624 = dma.done.wait (%p726_p8), %s203_s27, 128  }
  0x37   : > { %626 = vsyncadd (%p726_p8), %s203_s27, 4294967168  ;;  %s212_s5 = scalar_lea.sflag [#allocation6], %s787_s25  ;;  %s215_s16 = scalar_lea.vmem [#allocation5], %s429_s26 }
  0x38   : > { %628 = dma.done.wait (%p726_p8), %s212_s5, 128  }
  0x39   : > { %630 = vsyncadd (%p726_p8), %s212_s5, 4294967168  ;;  %s431_s18 = sshll.u32 %s787_s25, 5  ;;  %v255_v0 = vld [vmem:[%s206_s15] sm:$0xff]  ;;  %v256_v1 = vld [vmem:[%s215_s16] sm:$0xff]  ;;  %s438_s21 = sshll.u32 %s649_s12, 9 }
  0x3a   : > { %509 = vlog2.f32 %v255_v0  ;;  %v260_v2 = vsub.f32 1.0, %v255_v0  ;;  %v432_v3 = vmul.f32 -1.442695, %v255_v0  ;;  %s240_s19 = scalar_lea.vmem [#allocation7], %s431_s18  ;;  %v265_v10 = vsub.f32 1.0, %v256_v1  ;;  %s805_s3 = scalar_lea.hbm %s857_s2, %s438_s21 }
  0x3b   : > { %291 = vst [vmem:[%s240_s19 + $0x18] sm:$0xff] %v256_v1  ;;  %s308_s20 = sshll.u32 %s240_s19, 4  ;;  %s293_s7 = scalar_lea.sflag [#allocation4], %s787_s25  ;;  %s807_s20 = int_to_ptr.vmem [resolvable:$true] %s308_s20 }
  0x3c   : > { %511 = vlog2.f32 %v260_v2  ;;  %s573_s8 = scalar_lea.vmem %s807_s20, 512  ;;  %s661_s12 = smov [#allocation7]  }
  0x3d   : > { %513 = vpow2.f32 %v432_v3  ;;  %p574_p8 = scmp.ne.s32.totalorder %s807_s20, %s573_s8  ;;  %s577_s30 = sshll.u32 %s661_s12, 4  ;;  %s578_s30 = int_to_ptr.vmem [resolvable:$false] %s577_s30 }
  0x3e   : > { %s579_s4 = scalar_lea.vmem %s578_s30, 1024  ;;  %p580_p13 = scmp.lt.s32.totalorder %s807_s20, %s578_s30 }
  0x3f   : > { %p575_p0 = pnand %p574_p8, %p730_p9  ;;  %p581_p5 = scmp.lt.s32.totalorder %s579_s4, %s573_s8 }
  0x41   : > { %p576_p3 = pneg %p575_p0  ;;  %p582_p12 = por %p581_p5, %p580_p13 }
  0x43   : > { %p583_p6 = pnand %p582_p12, %p576_p3 }
  0x47   : > { %v510_v4 = vpop.eup %509 }
  0x48   : > { %v258_v5 = vmul.f32 0.6931472, %v510_v4 }
  0x49   : > { %v512_v6 = vpop.eup %511 }
  0x4a   : > { %v514_v7 = vpop.eup %513  ;;  %v259_v8 = vmax.f32 %v258_v5, -100.0  ;;  %v262_v9 = vmul.f32 0.6931472, %v512_v6 }
  0x4b   : > { %v272_v11 = vadd.f32 1.0, %v514_v7 }
  0x4c   : > { %v263_v12 = vmax.f32 %v262_v9, -100.0  ;;  %v264_v13 = vmul.f32 %v259_v8, %v256_v1 }
  0x4d   : > { %515 = vrcp.f32 %v272_v11 }
  0x4e   : > { %v266_v14 = vmul.f32 %v265_v10, %v263_v12 }
  0x50   : > { %v267_v15 = vadd.f32 %v266_v14, %v264_v13 }
  0x52   : > { %v268_v16 = vsub.f32 0.0, %v267_v15 }
  0x54   : > { %279 = vst [vmem:[%s240_s19] sm:$0xff] %v268_v16 }
  0x5a   : > { %v516_v17 = vpop.eup %515 }
  0x5b   : > { %v275_v18 = vmul.f32 %v516_v17, %v256_v1  ;;  %287 = vst [vmem:[%s240_s19 + $0x10] sm:$0xff] %v516_v17 }
  0x5d   : > { %283 = vst [vmem:[%s240_s19 + $0x8] sm:$0xff] %v275_v18 }
  0x5e   : > { %586 = shalt.err (!%p583_p6)
}
  0x5f   : > { %s587_s6 = scalar_lea.hbm %s805_s3, 512  ;;  %s591_s15 = scalar_lea.hbm %s857_s2, 1024 }
  0x60   : > { %p588_p7 = scmp.ne.s32.totalorder %s805_s3, %s587_s6  ;;  %p592_p4 = scmp.lt.s32.totalorder %s805_s3, %s857_s2 }
  0x61   : > { %p593_p10 = scmp.lt.s32.totalorder %s591_s15, %s587_s6 }
  0x62   : > { %p589_p1 = pnand %p588_p7, %p730_p9 }
  0x63   : > { %p594_p8 = por %p593_p10, %p592_p4 }
  0x64   : > { %p590_p2 = pneg %p589_p1 }
  0x66   : > { %p595_p0 = pnand %p594_p8, %p590_p2 }
  0x68   : > { %598 = shalt.err (!%p595_p0)
}
  0x69   : > { %s662_s18 = smov 128   ;;  %s663_s19 = smov 8  }
  0x6a   : > { %443 = dma.vmem_to_hbm [thread:$0]  (%p730_p9), %s807_s20, 512, %s805_s3, %s293_s7, %s662_s18, %s662_s18, %s663_s19  }
  0x6b PF: > { %s323_s21 = sand.u32 1, %s637_s9   ;;  %p864_p3 = scmp.ge.s32.totalorder %s657_s14, 2 }
  0x6c   : > { %s324_s28 = scalar_lea.sflag [#allocation4], %s323_s21 }
  0x6d   : > { %p453_p13 = pnand %p864_p3, %p737_p11 }
  0x6f   : > { %p454_p5 = pneg %p453_p13 }
  0x71   : > { %632 = dma.done.wait (%p454_p5), %s324_s28, 512  }
  0x72   : > { %634 = vsyncadd (%p454_p5), %s324_s28, 4294966784  ;;  %s21_s14 = sadd.s32 1, %s657_s14   ;;  %s865_s9 = smov %s641_s10 }
  0x73   : > { %p18_p12 = scmp.ge.s32.totalorder %s21_s14, 4   ;;  %s866_s10 = smov %s645_s11 }
  0x74   : > { %s867_s11 = smov %s735_s23  ;;  %s868_s12 = smov %s653_s13 }
  0x75   : > { %s869_s13 = smov %s871_s17  ;;  %20 = sbr.rel (!%p18_p12) target bundleno = 8 (0x8), region = 90 }
  0x7a   :  { %329 = vsyncpa [#allocation3], 1 }
  0x7b   :  { %331 = vsyncpa [#allocation3 + $0x1], 1 }
  0x7c   :  { %332 = vsyncpa [#allocation6], 1 }
  0x7d   :  { %334 = vsyncpa [#allocation6 + $0x1], 1 }
  0x7e   :  { %335 = vsyncpa [#allocation4], 1 }
  0x7f   :  { %337 = vsyncpa [#allocation4 + $0x1], 1 }

</bundles_post_ra>
